<compile_context>
chip_gen: v7x
topology: tpu7x:2x2x1
jax: 0.10.0
libtpu: 0.0.40
codegen_flags: <defaults>
</compile_context>

<pallas_src>
import functools

import jax
import jax.numpy as jnp
from jax.experimental import pallas as pl
from jax.experimental.pallas import tpu as pltpu

_LANES = 128
_SUBLANES = 8
_MAX_TILE_ROWS = 2048   # (2048, 128) f32 block = 1 MiB; 2x buffered = 2 MiB VMEM
_CHUNK_ROWS = 128       # inner-loop slice: 16 f32 vregs live per chunk
_NCORES = 2             # leading "parallel" axis: v7x megacore split


def _cdiv(a, b):
    return -(-a // b)


def _round_up(a, b):
    return _cdiv(a, b) * b


def _softplus(x):
    # numerically stable softplus: max(x,0) + log1p(exp(-|x|))
    return jnp.maximum(x, 0.0) + jnp.log1p(jnp.exp(-jnp.abs(x)))


def _make_elem_fn(gan_type, target_is_real, is_disc,
                  real_label_val, fake_label_val):
    """Return f(x_f32) -> per-element loss contribution (before mean)."""
    if gan_type == 'vanilla':
        t = real_label_val if target_is_real else fake_label_val
        # BCEWithLogitsLoss (stable form): max(x,0) - x*t + log(1 + exp(-|x|))
        def f(x):
            return jnp.maximum(x, 0.0) - x * t + jnp.log1p(jnp.exp(-jnp.abs(x)))
        return f
    elif gan_type == 'lsgan':
        t = real_label_val if target_is_real else fake_label_val
        def f(x):
            d = x - t
            return d * d
        return f
    elif gan_type == 'wgan':
        # -input.mean() if real else input.mean()
        sign = -1.0 if target_is_real else 1.0
        return lambda x: sign * x
    elif gan_type == 'wgan_softplus':
        # softplus(-x).mean() if real else softplus(x).mean()
        sign = -1.0 if target_is_real else 1.0
        return lambda x: _softplus(sign * x)
    elif gan_type == 'hinge':
        if is_disc:
            # input = -input if real else input ; relu(1 + input).mean()
            sign = -1.0 if target_is_real else 1.0
            return lambda x: jnp.maximum(1.0 + sign * x, 0.0)
        else:
            # -input.mean()
            return lambda x: -x
    else:
        raise NotImplementedError(f'GAN type {gan_type} is not implemented.')


def _block_loss_sum(x_ref, elem_fn, tile_rows, row_base, valid_rows, masked):
    """(8,128) f32 partial sum of elem_fn over this block, chunked to bound
    live ranges (loads pushed into the loop, single vreg-sized accumulator)."""
    chunk = min(_CHUNK_ROWS, tile_rows)
    n_full = tile_rows // chunk
    rem = tile_rows - n_full * chunk          # static, multiple of 8

    def chunk_sum(r0, nrows):
        xs = x_ref[pl.ds(r0, nrows), :].astype(jnp.float32)
        if masked:
            row = jax.lax.broadcasted_iota(jnp.int32, xs.shape, 0)
            m = (row_base + r0 + row) < valid_rows
            xs = jnp.where(m, xs, 0.0)        # keep elem_fn input finite
            vals = jnp.where(m, elem_fn(xs), 0.0)
        else:
            vals = elem_fn(xs)
        # (nrows,128) -> (nrows//8, 8, 128) -> sum over vreg groups -> (8,128):
        # layout-preserving reshape, pure VPU vreg adds (no cross-lane reduce).
        return jnp.sum(
            vals.reshape(nrows // _SUBLANES, _SUBLANES, _LANES), axis=0)

    acc = jnp.zeros((_SUBLANES, _LANES), jnp.float32)
    if n_full == 1:
        acc = acc + chunk_sum(0, chunk)
    elif n_full > 1:
        def body(j, a):
            r0 = pl.multiple_of(j * chunk, chunk)
            return a + chunk_sum(r0, chunk)
        acc = jax.lax.fori_loop(0, n_full, body, acc, unroll=True)
    if rem:
        acc = acc + chunk_sum(n_full * chunk, rem)
    return acc


def _gan_sum_kernel(x_ref, o_ref, *, elem_fn, tile_rows, steps_per_core,
                    valid_rows, needs_mask):
    """Accumulate this block's (8,128) loss partial into the per-core resident
    output block (zeroed at step 0 of the reduction axis)."""
    c = pl.program_id(0)
    i = pl.program_id(1)

    @pl.when(i == 0)
    def _():
        o_ref[...] = jnp.zeros_like(o_ref)

    if not needs_mask:
        o_ref[...] += _block_loss_sum(x_ref, elem_fn, tile_rows, 0,
                                      valid_rows, masked=False)
    else:
        blk = c * steps_per_core + i
        row_base = blk * tile_rows
        interior = (row_base + tile_rows) <= valid_rows

        @pl.when(interior)
        def _():
            o_ref[...] += _block_loss_sum(x_ref, elem_fn, tile_rows, 0,
                                          valid_rows, masked=False)

        @pl.when(jnp.logical_not(interior))
        def _():
            # Overhang / fully-out-of-range block: mask stale/garbage rows.
            o_ref[...] += _block_loss_sum(x_ref, elem_fn, tile_rows, row_base,
                                          valid_rows, masked=True)


def _gan_loss_sum(x2d, elem_fn, trans_per_elem):
    """Sum of elem_fn over all elements of x2d (shape (rows, 128))."""
    rows, cols = x2d.shape
    assert cols == _LANES and rows >= 1

    tile_rows = min(_MAX_TILE_ROWS, _round_up(rows, _SUBLANES))
    nblocks = _cdiv(rows, tile_rows)
    ncores = min(_NCORES, nblocks)
    steps = _cdiv(nblocks, ncores)
    needs_mask = (ncores * steps * tile_rows) != rows

    kernel = functools.partial(
        _gan_sum_kernel, elem_fn=elem_fn, tile_rows=tile_rows,
        steps_per_core=steps, valid_rows=rows, needs_mask=needs_mask)

    def x_index_map(c, i):
        blk = c * steps + i
        if needs_mask:
            # Clamp fully-out-of-range block indices (their rows are masked).
            blk = jnp.minimum(blk, nblocks - 1)
        return (blk, 0)

    bytes_accessed = (x2d.size * x2d.dtype.itemsize
                      + ncores * _SUBLANES * _LANES * 4)

    partials = pl.pallas_call(
        kernel,
        out_shape=jax.ShapeDtypeStruct((ncores, _SUBLANES, _LANES),
                                       jnp.float32),
        grid_spec=pltpu.PrefetchScalarGridSpec(
            num_scalar_prefetch=0,
            grid=(ncores, steps),
            in_specs=[pl.BlockSpec((tile_rows, _LANES), x_index_map)],
            out_specs=pl.BlockSpec((None, _SUBLANES, _LANES),
                                   lambda c, i: (c, 0, 0)),
        ),
        compiler_params=pltpu.CompilerParams(
            dimension_semantics=("parallel", "arbitrary")),
        cost_estimate=pl.CostEstimate(
            flops=int(8 * rows * _LANES),
            transcendentals=int(trans_per_elem) * int(rows * _LANES),
            bytes_accessed=int(bytes_accessed)),
    )(x2d)
    return jnp.sum(partials)


class GANLossPallas:
    """JAX/Pallas equivalent of the PyTorch GANLoss module (forward pass)."""

    def __init__(self, gan_type, real_label_val=1.0, fake_label_val=0.0,
                 loss_weight=1.0):
        if gan_type not in ('vanilla', 'lsgan', 'wgan', 'wgan_softplus',
                            'hinge'):
            raise NotImplementedError(
                f'GAN type {gan_type} is not implemented.')
        self.gan_type = gan_type
        self.real_label_val = float(real_label_val)
        self.fake_label_val = float(fake_label_val)
        self.loss_weight = float(loss_weight)

    def __call__(self, x, target_is_real, is_disc=False):
        # x: any shape (NCHW from PyTorch), native dtype (cast in-kernel).
        n = int(x.size)
        elem_fn = _make_elem_fn(self.gan_type, bool(target_is_real),
                                bool(is_disc), self.real_label_val,
                                self.fake_label_val)
        trans = 2 if self.gan_type in ('vanilla', 'wgan_softplus') else 0

        flat = jnp.reshape(x, (-1,))              # bitcast-level reshape
        rem = n % _LANES
        bulk = n - rem

        total = jnp.float32(0.0)
        if bulk:
            rows = bulk // _LANES
            if rem:
                # TODO(synk): the prefix slice for n % 128 != 0 may materialize
                # a bulk copy in XLA; true zero-copy would need a 1-D BlockSpec.
                x2d = flat[:bulk].reshape(rows, _LANES)
            else:
                x2d = flat.reshape(rows, _LANES)  # zero-copy: common case
            total = total + _gan_loss_sum(x2d, elem_fn, trans)
        if rem:
            # <128-element ragged tail: plain jnp, negligible cost, no pad copy.
            tail = flat[bulk:].astype(jnp.float32)
            total = total + jnp.sum(elem_fn(tail))

        loss = total / jnp.float32(n)
        if not is_disc:
            loss = loss * jnp.float32(self.loss_weight)
        return loss


def _ref_loss(gan_type, x, target_is_real, is_disc,
              real=1.0, fake=0.0, w=1.0):
    """Pure-jnp reference for a quick self-check."""
    x = x.astype(jnp.float32)
    if gan_type == 'vanilla':
        t = real if target_is_real else fake
        loss = jnp.mean(jnp.maximum(x, 0) - x * t
                        + jnp.log1p(jnp.exp(-jnp.abs(x))))
    elif gan_type == 'lsgan':
        t = real if target_is_real else fake
        loss = jnp.mean((x - t) ** 2)
    elif gan_type == 'wgan':
        loss = -jnp.mean(x) if target_is_real else jnp.mean(x)
    elif gan_type == 'wgan_softplus':
        z = -x if target_is_real else x
        loss = jnp.mean(jnp.maximum(z, 0) + jnp.log1p(jnp.exp(-jnp.abs(z))))
    elif gan_type == 'hinge':
        if is_disc:
            xi = -x if target_is_real else x
            loss = jnp.mean(jnp.maximum(1 + xi, 0))
        else:
            loss = -jnp.mean(x)
    return loss if is_disc else loss * w


if __name__ == "__main__":
    key = jax.random.PRNGKey(0)
    ok = True

    def check(x, gan_type, target_is_real, is_disc, w=2.0):
        global ok
        mod = GANLossPallas(gan_type, loss_weight=w)
        out = jax.block_until_ready(mod(x, target_is_real, is_disc))
        ref = _ref_loss(gan_type, x, target_is_real, is_disc, w=w)
        if not jnp.allclose(out, ref, rtol=1e-4, atol=1e-5):
            ok = False
            print(f"MISMATCH {gan_type} shape={tuple(x.shape)} "
                  f"dtype={x.dtype} real={target_is_real} disc={is_disc}: "
                  f"{out} vs {ref}")

    # Primary discriminator-style prediction map, NCHW: [B=2, C=4, H=16, W=16]
    keys = jax.random.split(key, 6)
    x_main = jax.random.normal(keys[0], (2, 4, 16, 16), dtype=jnp.float32)
    for gan_type in ('vanilla', 'lsgan', 'wgan', 'wgan_softplus', 'hinge'):
        for target_is_real in (True, False):
            for is_disc in (True, False):
                check(x_main, gan_type, target_is_real, is_disc)

    # Ragged size (<128-multiple): exercises the jnp tail + masked small block.
    x_ragged = jax.random.normal(keys[1], (2, 3, 5, 7), dtype=jnp.float32)
    check(x_ragged, 'vanilla', True, True)
    check(x_ragged, 'lsgan', False, False)

    # 128-multiple but rows not a multiple of 8: masked block overhang.
    x_odd_rows = jax.random.normal(keys[2], (1, 1, 9, 128), dtype=jnp.float32)
    check(x_odd_rows, 'hinge', True, True)

    # Multi-block with partial last block (stale-VMEM overhang path, 2 cores).
    x_overhang = jax.random.normal(keys[3], (2, 8, 128, 160), dtype=jnp.float32)
    check(x_overhang, 'vanilla', True, True)
    check(x_overhang, 'wgan_softplus', False, False)

    # Large, evenly-split multi-step grid (accumulator across several blocks).
    x_big = jax.random.normal(keys[4], (2, 8, 256, 256), dtype=jnp.float32)
    check(x_big, 'vanilla', True, True)
    check(x_big, 'hinge', False, False)

    # Non-f32 input (in-kernel cast path).
    x_bf16 = jax.random.normal(keys[5], (2, 4, 16, 16), dtype=jnp.bfloat16)
    check(x_bf16, 'lsgan', True, True)
    check(x_bf16, 'wgan', False, False)

    if ok:
        print("KERNEL_OK")
</pallas_src>

<mosaic_0001>
module attributes {stable_mosaic.version = 11 : i64} {
  func.func @_gan_sum_kernel(%arg0: i32, %arg1: i32, %arg2: memref<16x128xf32, #tpu.memory_space<vmem>>, %arg3: memref<1x8x128xf32, #tpu.memory_space<vmem>>) attributes {dimension_semantics = [#tpu.dimension_semantics<parallel>, #tpu.dimension_semantics<arbitrary>], iteration_bounds = array<i64: 1, 1>, scalar_prefetch = 0 : i64, scratch_operands = 0 : i64, tpu.core_type = #tpu.core_type<tc>, window_params = [{transform_indices = @transform_0, window_bounds = array<i64: 16, 128>}, {transform_indices = @transform_1, window_bounds = array<i64: 1, 8, 128>}]} {
    %c0_i32 = arith.constant 0 : i32
    %0 = arith.cmpi eq, %arg1, %c0_i32 : i32
    %1 = arith.extui %0 : i1 to i32
    %c0_i32_0 = arith.constant 0 : i32
    %2 = arith.cmpi ne, %1, %c0_i32_0 : i32
    scf.if %2 {
      %cst_12 = arith.constant 0.000000e+00 : f32
      %25 = vector.broadcast %cst_12 : f32 to vector<8x128xf32>
      %c0_13 = arith.constant 0 : index
      %c0_14 = arith.constant 0 : index
      %c0_15 = arith.constant 0 : index
      %26 = vector.load %arg3[%c0_13, %c0_14, %c0_15] : memref<1x8x128xf32, #tpu.memory_space<vmem>>, vector<1x8x128xf32>
      %27 = vector.shape_cast %26 : vector<1x8x128xf32> to vector<8x128xf32>
      %28 = vector.shape_cast %25 : vector<8x128xf32> to vector<1x8x128xf32>
      tpu.vector_store %arg3[%c0_13, %c0_14, %c0_15], %28 {strides = array<i32>} : memref<1x8x128xf32, #tpu.memory_space<vmem>>, vector<1x8x128xf32>,
    } else {
    }
    %c0 = arith.constant 0 : index
    %c0_1 = arith.constant 0 : index
    %c0_2 = arith.constant 0 : index
    %3 = vector.load %arg3[%c0, %c0_1, %c0_2] : memref<1x8x128xf32, #tpu.memory_space<vmem>>, vector<1x8x128xf32>
    %4 = vector.shape_cast %3 : vector<1x8x128xf32> to vector<8x128xf32>
    %cst = arith.constant 0.000000e+00 : f32
    %5 = vector.broadcast %cst : f32 to vector<8x128xf32>
    %c0_3 = arith.constant 0 : index
    %c0_4 = arith.constant 0 : index
    %6 = vector.load %arg2[%c0_3, %c0_4] : memref<16x128xf32, #tpu.memory_space<vmem>>, vector<16x128xf32>
    %cst_5 = arith.constant 0.000000e+00 : f32
    %7 = vector.broadcast %cst_5 : f32 to vector<16x128xf32>
    %8 = arith.maximumf %6, %7 : vector<16x128xf32>
    %cst_6 = arith.constant 1.000000e+00 : f32
    %9 = vector.broadcast %cst_6 : f32 to vector<16x128xf32>
    %10 = arith.mulf %6, %9 : vector<16x128xf32>
    %11 = arith.subf %8, %10 : vector<16x128xf32>
    %12 = math.absf %6 : vector<16x128xf32>
    %cst_7 = arith.constant 0.000000e+00 : f32
    %13 = vector.broadcast %cst_7 : f32 to vector<16x128xf32>
    %14 = arith.subf %13, %12 : vector<16x128xf32>
    %15 = math.exp %14 : vector<16x128xf32>
    %16 = math.log1p %15 : vector<16x128xf32>
    %17 = arith.addf %11, %16 : vector<16x128xf32>
    %18 = vector.shape_cast %17 : vector<16x128xf32> to vector<2x8x128xf32>
    %cst_8 = arith.constant dense<0.000000e+00> : vector<8x128xf32>
    %19 = vector.multi_reduction <add>, %18, %cst_8 [0] : vector<2x8x128xf32> to vector<8x128xf32>
    %20 = arith.addf %5, %19 : vector<8x128xf32>
    %21 = arith.addf %4, %20 : vector<8x128xf32>
    %c0_9 = arith.constant 0 : index
    %c0_10 = arith.constant 0 : index
    %c0_11 = arith.constant 0 : index
    %22 = vector.load %arg3[%c0_9, %c0_10, %c0_11] : memref<1x8x128xf32, #tpu.memory_space<vmem>>, vector<1x8x128xf32>
    %23 = vector.shape_cast %22 : vector<1x8x128xf32> to vector<8x128xf32>
    %24 = vector.shape_cast %21 : vector<8x128xf32> to vector<1x8x128xf32>
    tpu.vector_store %arg3[%c0_9, %c0_10, %c0_11], %24 {strides = array<i32>} : memref<1x8x128xf32, #tpu.memory_space<vmem>>, vector<1x8x128xf32>,
    return
  }
  func.func @transform_0(%arg0: i32, %arg1: i32) -> (i32, i32) {
    %c1_i32 = arith.constant 1 : i32
    %0 = arith.muli %arg0, %c1_i32 : i32
    %1 = arith.addi %0, %arg1 : i32
    %c0_i32 = arith.constant 0 : i32
    %c0_i32_0 = arith.constant 0 : i32
    return %1, %c0_i32 : i32, i32
  }
  func.func @transform_1(%arg0: i32, %arg1: i32) -> (i32, i32, i32) {
    %c0_i32 = arith.constant 0 : i32
    %c0_i32_0 = arith.constant 0 : i32
    %c0_i32_1 = arith.constant 0 : i32
    return %arg0, %c0_i32, %c0_i32_0 : i32, i32, i32
  }
}

</mosaic_0001>

<bundles_post_ra>
// kernel: tpu_custom_call.1
= control target key start
LH: loop header
LB: loop body
LE: loop exit
PB: predicated region body
PF: predicated region fallthrough
CT: control target
= control target key end

     0   :  { %6 = vsyncpa [#allocation3], 0  ;;  %s187_s0 = inlined_call_operand.hbm [shape: f32[16,128], index: 0, kind: input, shape index: {}]   ;;  %s188_s1 = inlined_call_operand.hbm [shape: f32[1,8,128], index: 1, kind: output, shape index: {}]  }
   0x1   :  { %7 = vsyncpa [#allocation4], 0  ;;  %s149_s6 = smov [#allocation2]   ;;  %s101_s10 = scalar_lea.hbm %s187_s0, 256 }
   0x2   :  { %s17_s7 = sshll.u32 %s149_s6, 4  ;;  %p102_p0 = scmp.ne.s32.totalorder %s187_s0, %s101_s10  ;;  %s18_s7 = int_to_ptr.vmem [resolvable:$true] %s17_s7 }
   0x3   :  { %p105_p1 = scmp.lt.u32.totalorder %s101_s10, %s187_s0 }
   0x5   :  { %p107_p2 = pnand %p105_p1, %p102_p0 }
   0x7   :  { %110 = shalt.err (!%p107_p2)
}
   0x8   :  { %s111_s15 = scalar_lea.vmem %s18_s7, 256  ;;  %p116_p4 = scmp.lt.s32.totalorder %s18_s7, %s18_s7 }
   0x9   :  { %p112_p3 = scmp.ne.s32.totalorder %s18_s7, %s111_s15  ;;  %p117_p5 = scmp.lt.s32.totalorder %s111_s15, %s111_s15 }
   0xb   :  { %p118_p6 = por %p117_p5, %p116_p4 }
   0xd   :  { %p119_p7 = pnand %p118_p6, %p112_p3 }
   0xf   :  { %122 = shalt.err (!%p119_p7)
}
  0x10   :  { %s150_s16 = smov 128   ;;  %s151_s17 = smov 8  }
  0x11   :  { %23 = dma.hbm_to_vmem [thread:$0]  %s187_s0, 256, %s18_s7, [#allocation3], %s150_s16, %s150_s16, %s151_s17  }
  0x12   :  { %145 = dma.done.wait [#allocation3], 256  }
  0x13   :  { %146 = vsyncadd [#allocation3], 4294967040  ;;  %v35_v0 = vld [vmem:[#allocation2] sm:$0xff]  ;;  %v36_v1 = vld [vmem:[#allocation2 + $0x8] sm:$0xff]  ;;  %s152_s0 = smov [#allocation5]  }
  0x14   :  { %v41_v2 = vand.u32 2147483647, %v35_v0  ;;  %v42_v3 = vand.u32 2147483647, %v36_v1  ;;  %v37_v15 = vmax.f32 %v35_v0, 0.0  ;;  %v38_v18 = vmax.f32 %v36_v1, 0.0 }
  0x15   :  { %s79_s20 = sshll.u32 %s152_s0, 4  ;;  %s80_s20 = int_to_ptr.vmem [resolvable:$true] %s79_s20 }
  0x16   :  { %v43_v4 = vsub.f32 0.0, %v41_v2  ;;  %v44_v5 = vsub.f32 0.0, %v42_v3  ;;  %v39_v22 = vsub.f32 %v37_v15, %v35_v0  ;;  %v40_v25 = vsub.f32 %v38_v18, %v36_v1  ;;  %s123_s21 = scalar_lea.vmem %s80_s20, 128  ;;  %p128_p9 = scmp.lt.s32.totalorder %s80_s20, %s80_s20 }
  0x17   :  { %p124_p8 = scmp.ne.s32.totalorder %s80_s20, %s123_s21  ;;  %p129_p10 = scmp.lt.s32.totalorder %s123_s21, %s123_s21 }
  0x18   :  { %v45_v6 = vmul.f32 1.442695, %v43_v4  ;;  %v47_v7 = vmul.f32 1.442695, %v44_v5 }
  0x19   :  { %p130_p11 = por %p129_p10, %p128_p9 }
  0x1a   :  { %93 = vpow2.f32 %v45_v6 }
  0x1b   :  { %95 = vpow2.f32 %v47_v7  ;;  %p131_p12 = pnand %p130_p11, %p124_p8 }
  0x24   :  { %v94_v8 = vpop.eup %93 }
  0x25   :  { %v96_v9 = vpop.eup %95  ;;  %v49_v10 = vadd.f32 1.0, %v94_v8  ;;  %v52_v12 = vmul.f32 -0.5, %v94_v8  ;;  %v55_v16 = vand.u32 2147483647, %v94_v8 }
  0x26   :  { %v58_v11 = vadd.f32 1.0, %v96_v9  ;;  %v61_v13 = vmul.f32 -0.5, %v96_v9  ;;  %v64_v19 = vand.u32 2147483647, %v96_v9 }
  0x27   :  { %97 = vlog2.f32 %v49_v10  ;;  %v53_v14 = vadd.f32 1.0, %v52_v12  ;;  %vm56_vm0 = vcmp.lt.f32.partialorder %v55_v16, 0.0004427343 }
  0x28   :  { %99 = vlog2.f32 %v58_v11  ;;  %v62_v17 = vadd.f32 1.0, %v61_v13  ;;  %vm65_vm1 = vcmp.lt.f32.partialorder %v64_v19, 0.0004427343 }
  0x29   :  { %v54_v20 = vmul.f32 %v94_v8, %v53_v14 }
  0x2a   :  { %v63_v23 = vmul.f32 %v96_v9, %v62_v17 }
  0x31   :  { %v98_v21 = vpop.eup %97 }
  0x32   :  { %v100_v24 = vpop.eup %99  ;;  %v51_v26 = vmul.f32 0.6931472, %v98_v21 }
  0x33   :  { %v60_v27 = vmul.f32 0.6931472, %v100_v24 }
  0x34   :  { %v57_v28 = vsel %vm56_vm0, %v54_v20, %v51_v26 }
  0x35   :  { %v66_v29 = vsel %vm65_vm1, %v63_v23, %v60_v27  ;;  %v67_v30 = vadd.f32 %v57_v28, %v39_v22 }
  0x36   :  { %v68_v31 = vadd.f32 %v66_v29, %v40_v25 }
  0x38   :  { %v69_v32 = vadd.f32 %v68_v31, %v67_v30 }
  0x3a   :  { %72 = vst [vmem:[#allocation5] sm:$0xff] %v69_v32 }
  0x3b   :  { %134 = shalt.err (!%p131_p12)
}
  0x3c   :  { %s135_s24 = scalar_lea.hbm %s188_s1, 128 }
  0x3d   :  { %p136_p13 = scmp.ne.s32.totalorder %s188_s1, %s135_s24  ;;  %p139_p0 = scmp.lt.u32.totalorder %s135_s24, %s188_s1 }
  0x3f   :  { %p141_p1 = pnand %p139_p0, %p136_p13 }
  0x41   :  { %144 = shalt.err (!%p141_p1)
}
  0x42   :  { %82 = dma.vmem_to_hbm [thread:$0]  %s80_s20, 128, %s188_s1, [#allocation4]  }
  0x43   :  { %147 = dma.done.wait [#allocation4], 128  }
  0x44   :  { %148 = vsyncadd [#allocation4], 4294967168 }
  0x45   :  { %86 = vsyncpa [#allocation3], 1 }
  0x46   :  { %87 = vsyncpa [#allocation4], 1 }

</bundles_post_ra>
